<compile_context>
chip_gen: v7x
topology: tpu7x:2x2x1
jax: 0.10.0
libtpu: 0.0.40
codegen_flags: <defaults>
</compile_context>

<pallas_src>
import jax
import jax.numpy as jnp
from jax.experimental import pallas as pl
from jax.experimental.pallas import tpu as pltpu

_BN_EPS = 1e-5
_GUMBEL_EPS = 1e-20
_LANE = 128


def _round_up(x, m):
    return (x + m - 1) // m * m


def _bn_train(x, gamma, beta):
    """nn.BatchNorm1d forward in training mode (batch stats, biased variance)."""
    mean = jnp.mean(x, axis=0, keepdims=True)
    var = jnp.mean((x - mean) ** 2, axis=0, keepdims=True)
    return (x - mean) * jax.lax.rsqrt(var + _BN_EPS) * gamma + beta


def _softmax(x):
    m = jnp.max(x, axis=-1, keepdims=True)
    e = jnp.exp(x - m)
    return e / jnp.sum(e, axis=-1, keepdims=True)


def _dot(a, b):
    return jnp.dot(a, b, preferred_element_type=jnp.float32)


def _pack_matrices(mats):
    """Column-pack 2-D f32 matrices into one slab (rows = max rows).

    Each block starts at a multiple of 8 lanes and is bumped to the next
    128-lane boundary if it would straddle one, so in-kernel static slices
    never cross a lane tile.  Returns (slab, {name: (col, rows, cols)}).
    """
    max_rows = max(m.shape[0] for _, m in mats)
    offs, col = {}, 0
    for name, m in mats:
        r, c = m.shape
        start = _round_up(col, 8)
        if (start + c - 1) // _LANE != start // _LANE:
            start = _round_up(start, _LANE)
        offs[name] = (start, r, c)
        col = start + c
    slab = jnp.zeros((max_rows, _round_up(col, _LANE)), jnp.float32)
    for name, m in mats:
        s, r, c = offs[name]
        slab = slab.at[:r, s:s + c].set(jnp.asarray(m, jnp.float32))
    return slab, offs


def _pack_vectors(vecs):
    """Row-pack 1-D f32 vectors (len <= 128) into a (n_vec, 128) slab."""
    rows = {}
    slab = jnp.zeros((len(vecs), _LANE), jnp.float32)
    for i, (name, v) in enumerate(vecs):
        v = jnp.asarray(v, jnp.float32).reshape(-1)
        slab = slab.at[i, :v.shape[0]].set(v)
        rows[name] = i
    return slab, rows


def _make_kernel(t1, t2, t3, h, y_dim, woff, vrow):
    """Build the fused InferenceNet kernel (closure over static dims/offsets)."""

    def kernel(xin_ref, w_ref, v_ref, out_ref):
        X = xin_ref[...]          # (B, t1 + y + t3 + 1) packed per-call slab
        W = w_ref[...]            # adjacency-folded weight slab
        V = v_ref[...]            # (n_vec, 128) bias/gamma/beta slab

        def w(name):
            s, r, c = woff[name]
            return W[:r, s:s + c]

        def v(name, n):
            i = vrow[name]
            return V[i:i + 1, :n]

        c = 0
        x = X[:, c:c + t1]; c += t1                       # x.squeeze(2)
        u = X[:, c:c + y_dim]; c += y_dim                 # gumbel base uniform
        nrm = X[:, c:c + t3]; c += t3                     # randn_like(std)
        inv_t = X[:, c:c + 1]                             # 1/temperature column

        # ---- hierarchical encoder (adjacency folded into the linears) ------
        # Linear biases before training-mode BN cancel exactly -> dropped.
        x2 = jnp.tanh(_bn_train(_dot(x, w("enc1")), v("g1", t2), v("be1", t2)))
        x3 = jnp.tanh(_bn_train(_dot(x2, w("enc2")), v("g2", t3), v("be2", t3)))

        # shared (t3, 2H) head: [adj_3.T @ W3 | adj_3.T @ W4a]
        q = _dot(x3, w("w34"))                            # (B, 2H)

        # ---- q(y|x): Linear -> BN -> Tanh -> GumbelSoftmax (hard=0) --------
        hy = jnp.tanh(_bn_train(q[:, :h], v("g3", h), v("be3", h)))
        logits = _dot(hy, w("wl")) + v("bl", y_dim)
        prob = _softmax(logits)
        gumbel = -jnp.log(-jnp.log(u + _GUMBEL_EPS) + _GUMBEL_EPS)
        ysamp = _softmax((logits + gumbel) * inv_t)

        # ---- q(z|x,y): concat realized as split matmul; fused mu/logvar ----
        hz = jnp.tanh(_bn_train(q[:, h:2 * h] + _dot(ysamp, w("w4b")),
                                v("g4", h), v("be4", h)))
        mv = _dot(hz, w("wmv")) + v("bmv", 2 * t3)
        mu = mv[:, :t3]
        var = jnp.exp(mv[:, t3:2 * t3])
        z = mu + nrm * jnp.sqrt(var + 1e-10)              # torch reparameterize

        # ---- single packed, lane-aligned writeback (one output DMA) --------
        out_ref[...] = jnp.zeros_like(out_ref)
        out_ref[:, 0 * _LANE:0 * _LANE + t3] = mu
        out_ref[:, 1 * _LANE:1 * _LANE + t3] = var
        out_ref[:, 2 * _LANE:2 * _LANE + t3] = z
        out_ref[:, 3 * _LANE:3 * _LANE + y_dim] = ysamp
        out_ref[:, 4 * _LANE:4 * _LANE + y_dim] = logits
        out_ref[:, 5 * _LANE:5 * _LANE + y_dim] = prob

    return kernel


def init_params(key, t1, t2, t3, h, y_dim):
    """Scaled-normal weights (stored as (in, out)), unit gammas, zero betas."""
    ks = jax.random.split(key, 7)

    def lin_w(k, fin, fout):
        return jax.random.normal(k, (fin, fout), jnp.float32) / jnp.sqrt(float(fin))

    def bn(n):
        return jnp.ones((n,), jnp.float32), jnp.zeros((n,), jnp.float32)

    w1 = lin_w(ks[0], t1, t2); g1, be1 = bn(t2)
    w2 = lin_w(ks[1], t2, t3); g2, be2 = bn(t3)
    w3 = lin_w(ks[2], t3, h);  g3, be3 = bn(h)
    wl = lin_w(ks[3], h, y_dim); bl = jnp.zeros((y_dim,), jnp.float32)
    w4 = lin_w(ks[4], t3 + y_dim, h); g4, be4 = bn(h)
    wmv = jnp.concatenate([lin_w(ks[5], h, t3), lin_w(ks[6], h, t3)], axis=1)
    bmv = jnp.zeros((2 * t3,), jnp.float32)
    # Linear biases feeding training-mode BatchNorm (b1..b4) are omitted: the
    # batch-mean subtraction cancels any per-feature constant exactly.
    return dict(w1=w1, g1=g1, be1=be1, w2=w2, g2=g2, be2=be2,
                w3=w3, g3=g3, be3=be3, wl=wl, bl=bl,
                w4a=w4[:t3], w4b=w4[t3:], g4=g4, be4=be4,
                wmv=wmv, bmv=bmv)


def build_inference_forward(adj, adj_2, adj_3, params, *, t1, t2, t3, h, y_dim):
    """Packs & algebraically folds params once; returns jitted forward(x, T, key)
    that mirrors InferenceNet.forward(x, adj, adj_2, adj_3, temperature, hard=0)."""
    a1t = jnp.asarray(adj, jnp.float32).T
    a2t = jnp.asarray(adj_2, jnp.float32).T
    a3t = jnp.asarray(adj_3, jnp.float32).T

    # Fold the adjacency matmuls into the following Linear weights (exact
    # algebra; no nonlinearity in between) -> 6 matmuls per call instead of 10.
    enc1 = a1t @ params["w1"]                               # (t1, t2)
    enc2 = a2t @ params["w2"]                               # (t2, t3)
    w34 = jnp.concatenate([a3t @ params["w3"],
                           a3t @ params["w4a"]], axis=1)    # (t3, 2h)

    w_slab, woff = _pack_matrices([
        ("enc1", enc1), ("enc2", enc2), ("w34", w34),
        ("wl", params["wl"]), ("w4b", params["w4b"]), ("wmv", params["wmv"]),
    ])
    v_slab, vrow = _pack_vectors([
        ("g1", params["g1"]), ("be1", params["be1"]),
        ("g2", params["g2"]), ("be2", params["be2"]),
        ("g3", params["g3"]), ("be3", params["be3"]),
        ("g4", params["g4"]), ("be4", params["be4"]),
        ("bl", params["bl"]), ("bmv", params["bmv"]),
    ])
    kernel = _make_kernel(t1, t2, t3, h, y_dim, woff, vrow)
    out_width = 6 * _LANE
    vmem = pl.BlockSpec(memory_space=pltpu.MemorySpace.VMEM)

    @jax.jit
    def forward(x, temperature, key):
        b = x.shape[0]
        x_sq = x[:, :, 0].astype(jnp.float32)                 # x.squeeze(2)
        ku, kn = jax.random.split(key)
        u = jax.random.uniform(ku, (b, y_dim), jnp.float32)   # gumbel base
        nrm = jax.random.normal(kn, (b, t3), jnp.float32)     # randn_like(std)
        inv_t = jnp.broadcast_to(
            1.0 / jnp.asarray(temperature, jnp.float32), (b, 1))
        xin = jnp.concatenate([x_sq, u, nrm, inv_t], axis=1)  # one per-call DMA

        out = pl.pallas_call(
            kernel,
            out_shape=jax.ShapeDtypeStruct((b, out_width), jnp.float32),
            in_specs=[vmem, vmem, vmem],
            out_specs=vmem,
        )(xin, w_slab, v_slab)

        # TODO(synk): BatchNorm running_mean/var tracking (eval mode) and the
        # hard=1 straight-through Gumbel path are not implemented; this module's
        # forward path uses training-mode BN and hard=0.
        return {
            "mean":        out[:, 0 * _LANE:0 * _LANE + t3],
            "var":         out[:, 1 * _LANE:1 * _LANE + t3],
            "gaussian":    out[:, 2 * _LANE:2 * _LANE + t3],
            "categorical": out[:, 3 * _LANE:3 * _LANE + y_dim],
            "logits":      out[:, 4 * _LANE:4 * _LANE + y_dim],
            "prob_cat":    out[:, 5 * _LANE:5 * _LANE + y_dim],
        }

    return forward


def reference_forward(adj, adj_2, adj_3, params, x, temperature, key,
                      *, t3, y_dim):
    """Pure-JAX reference mirroring InferenceNet.forward (same RNG draws)."""
    a1t = jnp.asarray(adj, jnp.float32).T
    a2t = jnp.asarray(adj_2, jnp.float32).T
    a3t = jnp.asarray(adj_3, jnp.float32).T
    b = x.shape[0]
    x_sq = x[:, :, 0].astype(jnp.float32)
    ku, kn = jax.random.split(key)
    u = jax.random.uniform(ku, (b, y_dim), jnp.float32)
    nrm = jax.random.normal(kn, (b, t3), jnp.float32)

    x1 = x_sq @ a1t
    x2 = jnp.tanh(_bn_train(x1 @ params["w1"], params["g1"], params["be1"]))
    x2 = x2 @ a2t
    x3 = jnp.tanh(_bn_train(x2 @ params["w2"], params["g2"], params["be2"]))
    x3 = x3 @ a3t
    hy = jnp.tanh(_bn_train(x3 @ params["w3"], params["g3"], params["be3"]))
    logits = hy @ params["wl"] + params["bl"]
    prob = jax.nn.softmax(logits, axis=-1)
    gumbel = -jnp.log(-jnp.log(u + _GUMBEL_EPS) + _GUMBEL_EPS)
    ysamp = jax.nn.softmax((logits + gumbel) / temperature, axis=-1)
    hz = jnp.tanh(_bn_train(x3 @ params["w4a"] + ysamp @ params["w4b"],
                            params["g4"], params["be4"]))
    mv = hz @ params["wmv"] + params["bmv"]
    mu = mv[:, :t3]
    var = jnp.exp(mv[:, t3:])
    z = mu + nrm * jnp.sqrt(var + 1e-10)
    return {"mean": mu, "var": var, "gaussian": z,
            "categorical": ysamp, "logits": logits, "prob_cat": prob}


if __name__ == "__main__":
    # Small shapes consistent with the module (y_dim=10 as set in `net`).
    B, T1, T2, T3, H, Y = 8, 32, 16, 8, 32, 10

    root = jax.random.PRNGKey(0)
    k_x, k_a1, k_a2, k_a3, k_p, k_noise = jax.random.split(root, 6)

    x = jax.random.normal(k_x, (B, T1, 1), jnp.float32)   # InferenceNet input
    adj = jax.random.normal(k_a1, (T1, T1), jnp.float32)
    adj_2 = jax.random.normal(k_a2, (T2, T2), jnp.float32)
    adj_3 = jax.random.normal(k_a3, (T3, T3), jnp.float32)

    params = init_params(k_p, T1, T2, T3, H, Y)
    forward = build_inference_forward(adj, adj_2, adj_3, params,
                                      t1=T1, t2=T2, t3=T3, h=H, y_dim=Y)

    out = forward(x, 1.0, k_noise)
    jax.block_until_ready(out)

    assert out["mean"].shape == (B, T3)
    assert out["var"].shape == (B, T3)
    assert out["gaussian"].shape == (B, T3)
    assert out["categorical"].shape == (B, Y)
    assert out["logits"].shape == (B, Y)
    assert out["prob_cat"].shape == (B, Y)
    assert bool(jnp.all(jnp.isfinite(out["gaussian"])))
    assert bool(jnp.allclose(jnp.sum(out["prob_cat"], axis=-1), 1.0, atol=1e-4))
    assert bool(jnp.allclose(jnp.sum(out["categorical"], axis=-1), 1.0, atol=1e-4))

    ref = reference_forward(adj, adj_2, adj_3, params, x, 1.0, k_noise,
                            t3=T3, y_dim=Y)
    for name in ("mean", "var", "gaussian", "categorical", "logits", "prob_cat"):
        assert bool(jnp.allclose(out[name], ref[name], rtol=1e-2, atol=1e-2)), name

    print("KERNEL_OK")
</pallas_src>

<mosaic_0001>
module attributes {stable_mosaic.version = 11 : i64} {
  func.func @kernel(%arg0: memref<8x51xf32, #tpu.memory_space<vmem>>, %arg1: memref<32x256xf32, #tpu.memory_space<vmem>>, %arg2: memref<10x128xf32, #tpu.memory_space<vmem>>, %arg3: memref<8x768xf32, #tpu.memory_space<vmem>>) attributes {dimension_semantics = [], scalar_prefetch = 0 : i64, scratch_operands = 0 : i64, tpu.core_type = #tpu.core_type<tc>} {
    %c0 = arith.constant 0 : index
    %c0_0 = arith.constant 0 : index
    %0 = vector.load %arg0[%c0, %c0_0] : memref<8x51xf32, #tpu.memory_space<vmem>>, vector<8x51xf32>
    %c0_1 = arith.constant 0 : index
    %c0_2 = arith.constant 0 : index
    %1 = vector.load %arg1[%c0_1, %c0_2] : memref<32x256xf32, #tpu.memory_space<vmem>>, vector<32x256xf32>
    %c0_3 = arith.constant 0 : index
    %c0_4 = arith.constant 0 : index
    %2 = vector.load %arg2[%c0_3, %c0_4] : memref<10x128xf32, #tpu.memory_space<vmem>>, vector<10x128xf32>
    %3 = vector.extract_strided_slice %0 {offsets = [0, 0], sizes = [8, 32], strides = [1, 1]} : vector<8x51xf32> to vector<8x32xf32>
    %4 = vector.extract_strided_slice %0 {offsets = [0, 32], sizes = [8, 10], strides = [1, 1]} : vector<8x51xf32> to vector<8x10xf32>
    %5 = vector.extract_strided_slice %0 {offsets = [0, 42], sizes = [8, 8], strides = [1, 1]} : vector<8x51xf32> to vector<8x8xf32>
    %6 = vector.extract_strided_slice %0 {offsets = [0, 50], sizes = [8, 1], strides = [1, 1]} : vector<8x51xf32> to vector<8x1xf32>
    %7 = vector.extract_strided_slice %1 {offsets = [0, 0], sizes = [32, 16], strides = [1, 1]} : vector<32x256xf32> to vector<32x16xf32>
    %cst = arith.constant dense<0.000000e+00> : vector<8x16xf32>
    %8 = tpu.matmul %3, %7, %cst {dimension_numbers = #tpu.dot_dimension_numbers<[1], [0], [0], [1], [0, 0, 1, 1], [], []>} : vector<8x32xf32>, vector<32x16xf32>, vector<8x16xf32> -> vector<8x16xf32>
    %9 = vector.extract_strided_slice %2 {offsets = [0, 0], sizes = [1, 16], strides = [1, 1]} : vector<10x128xf32> to vector<1x16xf32>
    %10 = vector.extract_strided_slice %2 {offsets = [1, 0], sizes = [1, 16], strides = [1, 1]} : vector<10x128xf32> to vector<1x16xf32>
    %cst_5 = arith.constant dense<0.000000e+00> : vector<16xf32>
    %11 = vector.multi_reduction <add>, %8, %cst_5 [0] : vector<8x16xf32> to vector<16xf32>
    %12 = vector.shape_cast %11 : vector<16xf32> to vector<1x16xf32>
    %cst_6 = arith.constant 8.000000e+00 : f32
    %13 = vector.broadcast %cst_6 : f32 to vector<1x16xf32>
    %14 = arith.divf %12, %13 : vector<1x16xf32>
    %15 = vector.broadcast %14 : vector<1x16xf32> to vector<8x16xf32>
    %16 = arith.subf %8, %15 : vector<8x16xf32>
    %17 = arith.mulf %16, %16 : vector<8x16xf32>
    %cst_7 = arith.constant dense<0.000000e+00> : vector<16xf32>
    %18 = vector.multi_reduction <add>, %17, %cst_7 [0] : vector<8x16xf32> to vector<16xf32>
    %19 = vector.shape_cast %18 : vector<16xf32> to vector<1x16xf32>
    %cst_8 = arith.constant 8.000000e+00 : f32
    %20 = vector.broadcast %cst_8 : f32 to vector<1x16xf32>
    %21 = arith.divf %19, %20 : vector<1x16xf32>
    %22 = vector.broadcast %14 : vector<1x16xf32> to vector<8x16xf32>
    %23 = arith.subf %8, %22 : vector<8x16xf32>
    %cst_9 = arith.constant 9.99999974E-6 : f32
    %24 = vector.broadcast %cst_9 : f32 to vector<1x16xf32>
    %25 = arith.addf %21, %24 : vector<1x16xf32>
    %26 = math.rsqrt %25 : vector<1x16xf32>
    %27 = vector.broadcast %26 : vector<1x16xf32> to vector<8x16xf32>
    %28 = arith.mulf %23, %27 : vector<8x16xf32>
    %29 = vector.broadcast %9 : vector<1x16xf32> to vector<8x16xf32>
    %30 = arith.mulf %28, %29 : vector<8x16xf32>
    %31 = vector.broadcast %10 : vector<1x16xf32> to vector<8x16xf32>
    %32 = arith.addf %30, %31 : vector<8x16xf32>
    %33 = math.tanh %32 : vector<8x16xf32>
    %34 = vector.extract_strided_slice %1 {offsets = [0, 16], sizes = [16, 8], strides = [1, 1]} : vector<32x256xf32> to vector<16x8xf32>
    %cst_10 = arith.constant dense<0.000000e+00> : vector<8x8xf32>
    %35 = tpu.matmul %33, %34, %cst_10 {dimension_numbers = #tpu.dot_dimension_numbers<[1], [0], [0], [1], [0, 0, 1, 1], [], []>} : vector<8x16xf32>, vector<16x8xf32>, vector<8x8xf32> -> vector<8x8xf32>
    %36 = vector.extract_strided_slice %2 {offsets = [2, 0], sizes = [1, 8], strides = [1, 1]} : vector<10x128xf32> to vector<1x8xf32>
    %37 = vector.extract_strided_slice %2 {offsets = [3, 0], sizes = [1, 8], strides = [1, 1]} : vector<10x128xf32> to vector<1x8xf32>
    %cst_11 = arith.constant dense<0.000000e+00> : vector<8xf32>
    %38 = vector.multi_reduction <add>, %35, %cst_11 [0] : vector<8x8xf32> to vector<8xf32>
    %39 = vector.shape_cast %38 : vector<8xf32> to vector<1x8xf32>
    %cst_12 = arith.constant 8.000000e+00 : f32
    %40 = vector.broadcast %cst_12 : f32 to vector<1x8xf32>
    %41 = arith.divf %39, %40 : vector<1x8xf32>
    %42 = vector.broadcast %41 : vector<1x8xf32> to vector<8x8xf32>
    %43 = arith.subf %35, %42 : vector<8x8xf32>
    %44 = arith.mulf %43, %43 : vector<8x8xf32>
    %cst_13 = arith.constant dense<0.000000e+00> : vector<8xf32>
    %45 = vector.multi_reduction <add>, %44, %cst_13 [0] : vector<8x8xf32> to vector<8xf32>
    %46 = vector.shape_cast %45 : vector<8xf32> to vector<1x8xf32>
    %cst_14 = arith.constant 8.000000e+00 : f32
    %47 = vector.broadcast %cst_14 : f32 to vector<1x8xf32>
    %48 = arith.divf %46, %47 : vector<1x8xf32>
    %49 = vector.broadcast %41 : vector<1x8xf32> to vector<8x8xf32>
    %50 = arith.subf %35, %49 : vector<8x8xf32>
    %cst_15 = arith.constant 9.99999974E-6 : f32
    %51 = vector.broadcast %cst_15 : f32 to vector<1x8xf32>
    %52 = arith.addf %48, %51 : vector<1x8xf32>
    %53 = math.rsqrt %52 : vector<1x8xf32>
    %54 = vector.broadcast %53 : vector<1x8xf32> to vector<8x8xf32>
    %55 = arith.mulf %50, %54 : vector<8x8xf32>
    %56 = vector.broadcast %36 : vector<1x8xf32> to vector<8x8xf32>
    %57 = arith.mulf %55, %56 : vector<8x8xf32>
    %58 = vector.broadcast %37 : vector<1x8xf32> to vector<8x8xf32>
    %59 = arith.addf %57, %58 : vector<8x8xf32>
    %60 = math.tanh %59 : vector<8x8xf32>
    %61 = vector.extract_strided_slice %1 {offsets = [0, 24], sizes = [8, 64], strides = [1, 1]} : vector<32x256xf32> to vector<8x64xf32>
    %cst_16 = arith.constant dense<0.000000e+00> : vector<8x64xf32>
    %62 = tpu.matmul %60, %61, %cst_16 {dimension_numbers = #tpu.dot_dimension_numbers<[1], [0], [0], [1], [0, 0, 1, 1], [], []>} : vector<8x8xf32>, vector<8x64xf32>, vector<8x64xf32> -> vector<8x64xf32>
    %63 = vector.extract_strided_slice %62 {offsets = [0, 0], sizes = [8, 32], strides = [1, 1]} : vector<8x64xf32> to vector<8x32xf32>
    %64 = vector.extract_strided_slice %2 {offsets = [4, 0], sizes = [1, 32], strides = [1, 1]} : vector<10x128xf32> to vector<1x32xf32>
    %65 = vector.extract_strided_slice %2 {offsets = [5, 0], sizes = [1, 32], strides = [1, 1]} : vector<10x128xf32> to vector<1x32xf32>
    %cst_17 = arith.constant dense<0.000000e+00> : vector<32xf32>
    %66 = vector.multi_reduction <add>, %63, %cst_17 [0] : vector<8x32xf32> to vector<32xf32>
    %67 = vector.shape_cast %66 : vector<32xf32> to vector<1x32xf32>
    %cst_18 = arith.constant 8.000000e+00 : f32
    %68 = vector.broadcast %cst_18 : f32 to vector<1x32xf32>
    %69 = arith.divf %67, %68 : vector<1x32xf32>
    %70 = vector.broadcast %69 : vector<1x32xf32> to vector<8x32xf32>
    %71 = arith.subf %63, %70 : vector<8x32xf32>
    %72 = arith.mulf %71, %71 : vector<8x32xf32>
    %cst_19 = arith.constant dense<0.000000e+00> : vector<32xf32>
    %73 = vector.multi_reduction <add>, %72, %cst_19 [0] : vector<8x32xf32> to vector<32xf32>
    %74 = vector.shape_cast %73 : vector<32xf32> to vector<1x32xf32>
    %cst_20 = arith.constant 8.000000e+00 : f32
    %75 = vector.broadcast %cst_20 : f32 to vector<1x32xf32>
    %76 = arith.divf %74, %75 : vector<1x32xf32>
    %77 = vector.broadcast %69 : vector<1x32xf32> to vector<8x32xf32>
    %78 = arith.subf %63, %77 : vector<8x32xf32>
    %cst_21 = arith.constant 9.99999974E-6 : f32
    %79 = vector.broadcast %cst_21 : f32 to vector<1x32xf32>
    %80 = arith.addf %76, %79 : vector<1x32xf32>
    %81 = math.rsqrt %80 : vector<1x32xf32>
    %82 = vector.broadcast %81 : vector<1x32xf32> to vector<8x32xf32>
    %83 = arith.mulf %78, %82 : vector<8x32xf32>
    %84 = vector.broadcast %64 : vector<1x32xf32> to vector<8x32xf32>
    %85 = arith.mulf %83, %84 : vector<8x32xf32>
    %86 = vector.broadcast %65 : vector<1x32xf32> to vector<8x32xf32>
    %87 = arith.addf %85, %86 : vector<8x32xf32>
    %88 = math.tanh %87 : vector<8x32xf32>
    %89 = vector.extract_strided_slice %1 {offsets = [0, 88], sizes = [32, 10], strides = [1, 1]} : vector<32x256xf32> to vector<32x10xf32>
    %cst_22 = arith.constant dense<0.000000e+00> : vector<8x10xf32>
    %90 = tpu.matmul %88, %89, %cst_22 {dimension_numbers = #tpu.dot_dimension_numbers<[1], [0], [0], [1], [0, 0, 1, 1], [], []>} : vector<8x32xf32>, vector<32x10xf32>, vector<8x10xf32> -> vector<8x10xf32>
    %91 = vector.extract_strided_slice %2 {offsets = [8, 0], sizes = [1, 10], strides = [1, 1]} : vector<10x128xf32> to vector<1x10xf32>
    %92 = vector.broadcast %91 : vector<1x10xf32> to vector<8x10xf32>
    %93 = arith.addf %90, %92 : vector<8x10xf32>
    %cst_23 = arith.constant dense<0xFF800000> : vector<8xf32>
    %94 = vector.multi_reduction <maximumf>, %93, %cst_23 [1] : vector<8x10xf32> to vector<8xf32>
    %95 = vector.shape_cast %94 : vector<8xf32> to vector<8x1xf32>
    %96 = vector.broadcast %95 : vector<8x1xf32> to vector<8x10xf32>
    %97 = arith.subf %93, %96 : vector<8x10xf32>
    %98 = math.exp %97 : vector<8x10xf32>
    %cst_24 = arith.constant dense<0.000000e+00> : vector<8xf32>
    %99 = vector.multi_reduction <add>, %98, %cst_24 [1] : vector<8x10xf32> to vector<8xf32>
    %100 = vector.shape_cast %99 : vector<8xf32> to vector<8x1xf32>
    %101 = vector.broadcast %100 : vector<8x1xf32> to vector<8x10xf32>
    %102 = arith.divf %98, %101 : vector<8x10xf32>
    %cst_25 = arith.constant 9.99999968E-21 : f32
    %103 = vector.broadcast %cst_25 : f32 to vector<8x10xf32>
    %104 = arith.addf %4, %103 : vector<8x10xf32>
    %105 = math.log %104 : vector<8x10xf32>
    %cst_26 = arith.constant 0.000000e+00 : f32
    %106 = vector.broadcast %cst_26 : f32 to vector<8x10xf32>
    %107 = arith.subf %106, %105 : vector<8x10xf32>
    %cst_27 = arith.constant 9.99999968E-21 : f32
    %108 = vector.broadcast %cst_27 : f32 to vector<8x10xf32>
    %109 = arith.addf %107, %108 : vector<8x10xf32>
    %110 = math.log %109 : vector<8x10xf32>
    %cst_28 = arith.constant 0.000000e+00 : f32
    %111 = vector.broadcast %cst_28 : f32 to vector<8x10xf32>
    %112 = arith.subf %111, %110 : vector<8x10xf32>
    %113 = arith.addf %93, %112 : vector<8x10xf32>
    %114 = vector.broadcast %6 : vector<8x1xf32> to vector<8x10xf32>
    %115 = arith.mulf %113, %114 : vector<8x10xf32>
    %cst_29 = arith.constant dense<0xFF800000> : vector<8xf32>
    %116 = vector.multi_reduction <maximumf>, %115, %cst_29 [1] : vector<8x10xf32> to vector<8xf32>
    %117 = vector.shape_cast %116 : vector<8xf32> to vector<8x1xf32>
    %118 = vector.broadcast %117 : vector<8x1xf32> to vector<8x10xf32>
    %119 = arith.subf %115, %118 : vector<8x10xf32>
    %120 = math.exp %119 : vector<8x10xf32>
    %cst_30 = arith.constant dense<0.000000e+00> : vector<8xf32>
    %121 = vector.multi_reduction <add>, %120, %cst_30 [1] : vector<8x10xf32> to vector<8xf32>
    %122 = vector.shape_cast %121 : vector<8xf32> to vector<8x1xf32>
    %123 = vector.broadcast %122 : vector<8x1xf32> to vector<8x10xf32>
    %124 = arith.divf %120, %123 : vector<8x10xf32>
    %125 = vector.extract_strided_slice %62 {offsets = [0, 32], sizes = [8, 32], strides = [1, 1]} : vector<8x64xf32> to vector<8x32xf32>
    %126 = vector.extract_strided_slice %1 {offsets = [0, 128], sizes = [10, 32], strides = [1, 1]} : vector<32x256xf32> to vector<10x32xf32>
    %cst_31 = arith.constant dense<0.000000e+00> : vector<8x32xf32>
    %127 = tpu.matmul %124, %126, %cst_31 {dimension_numbers = #tpu.dot_dimension_numbers<[1], [0], [0], [1], [0, 0, 1, 1], [], []>} : vector<8x10xf32>, vector<10x32xf32>, vector<8x32xf32> -> vector<8x32xf32>
    %128 = arith.addf %125, %127 : vector<8x32xf32>
    %129 = vector.extract_strided_slice %2 {offsets = [6, 0], sizes = [1, 32], strides = [1, 1]} : vector<10x128xf32> to vector<1x32xf32>
    %130 = vector.extract_strided_slice %2 {offsets = [7, 0], sizes = [1, 32], strides = [1, 1]} : vector<10x128xf32> to vector<1x32xf32>
    %cst_32 = arith.constant dense<0.000000e+00> : vector<32xf32>
    %131 = vector.multi_reduction <add>, %128, %cst_32 [0] : vector<8x32xf32> to vector<32xf32>
    %132 = vector.shape_cast %131 : vector<32xf32> to vector<1x32xf32>
    %cst_33 = arith.constant 8.000000e+00 : f32
    %133 = vector.broadcast %cst_33 : f32 to vector<1x32xf32>
    %134 = arith.divf %132, %133 : vector<1x32xf32>
    %135 = vector.broadcast %134 : vector<1x32xf32> to vector<8x32xf32>
    %136 = arith.subf %128, %135 : vector<8x32xf32>
    %137 = arith.mulf %136, %136 : vector<8x32xf32>
    %cst_34 = arith.constant dense<0.000000e+00> : vector<32xf32>
    %138 = vector.multi_reduction <add>, %137, %cst_34 [0] : vector<8x32xf32> to vector<32xf32>
    %139 = vector.shape_cast %138 : vector<32xf32> to vector<1x32xf32>
    %cst_35 = arith.constant 8.000000e+00 : f32
    %140 = vector.broadcast %cst_35 : f32 to vector<1x32xf32>
    %141 = arith.divf %139, %140 : vector<1x32xf32>
    %142 = vector.broadcast %134 : vector<1x32xf32> to vector<8x32xf32>
    %143 = arith.subf %128, %142 : vector<8x32xf32>
    %cst_36 = arith.constant 9.99999974E-6 : f32
    %144 = vector.broadcast %cst_36 : f32 to vector<1x32xf32>
    %145 = arith.addf %141, %144 : vector<1x32xf32>
    %146 = math.rsqrt %145 : vector<1x32xf32>
    %147 = vector.broadcast %146 : vector<1x32xf32> to vector<8x32xf32>
    %148 = arith.mulf %143, %147 : vector<8x32xf32>
    %149 = vector.broadcast %129 : vector<1x32xf32> to vector<8x32xf32>
    %150 = arith.mulf %148, %149 : vector<8x32xf32>
    %151 = vector.broadcast %130 : vector<1x32xf32> to vector<8x32xf32>
    %152 = arith.addf %150, %151 : vector<8x32xf32>
    %153 = math.tanh %152 : vector<8x32xf32>
    %154 = vector.extract_strided_slice %1 {offsets = [0, 160], sizes = [32, 16], strides = [1, 1]} : vector<32x256xf32> to vector<32x16xf32>
    %cst_37 = arith.constant dense<0.000000e+00> : vector<8x16xf32>
    %155 = tpu.matmul %153, %154, %cst_37 {dimension_numbers = #tpu.dot_dimension_numbers<[1], [0], [0], [1], [0, 0, 1, 1], [], []>} : vector<8x32xf32>, vector<32x16xf32>, vector<8x16xf32> -> vector<8x16xf32>
    %156 = vector.extract_strided_slice %2 {offsets = [9, 0], sizes = [1, 16], strides = [1, 1]} : vector<10x128xf32> to vector<1x16xf32>
    %157 = vector.broadcast %156 : vector<1x16xf32> to vector<8x16xf32>
    %158 = arith.addf %155, %157 : vector<8x16xf32>
    %159 = vector.extract_strided_slice %158 {offsets = [0, 0], sizes = [8, 8], strides = [1, 1]} : vector<8x16xf32> to vector<8x8xf32>
    %160 = vector.extract_strided_slice %158 {offsets = [0, 8], sizes = [8, 8], strides = [1, 1]} : vector<8x16xf32> to vector<8x8xf32>
    %161 = math.exp %160 : vector<8x8xf32>
    %cst_38 = arith.constant 1.000000e-10 : f32
    %162 = vector.broadcast %cst_38 : f32 to vector<8x8xf32>
    %163 = arith.addf %161, %162 : vector<8x8xf32>
    %164 = math.sqrt %163 : vector<8x8xf32>
    %165 = arith.mulf %5, %164 : vector<8x8xf32>
    %166 = arith.addf %159, %165 : vector<8x8xf32>
    %cst_39 = arith.constant 0.000000e+00 : f32
    %167 = vector.broadcast %cst_39 : f32 to vector<8x768xf32>
    %c0_40 = arith.constant 0 : index
    %c0_41 = arith.constant 0 : index
    %168 = vector.load %arg3[%c0_40, %c0_41] : memref<8x768xf32, #tpu.memory_space<vmem>>, vector<8x768xf32>
    tpu.vector_store %arg3[%c0_40, %c0_41], %167 {strides = array<i32>} : memref<8x768xf32, #tpu.memory_space<vmem>>, vector<8x768xf32>,
    %c0_42 = arith.constant 0 : index
    %c0_43 = arith.constant 0 : index
    %169 = vector.load %arg3[%c0_42, %c0_43] : memref<8x768xf32, #tpu.memory_space<vmem>>, vector<8x8xf32>
    tpu.vector_store %arg3[%c0_42, %c0_43], %159 {strides = array<i32>} : memref<8x768xf32, #tpu.memory_space<vmem>>, vector<8x8xf32>,
    %c0_44 = arith.constant 0 : index
    %c128 = arith.constant 128 : index
    %170 = vector.load %arg3[%c0_44, %c128] : memref<8x768xf32, #tpu.memory_space<vmem>>, vector<8x8xf32>
    tpu.vector_store %arg3[%c0_44, %c128], %161 {strides = array<i32>} : memref<8x768xf32, #tpu.memory_space<vmem>>, vector<8x8xf32>,
    %c0_45 = arith.constant 0 : index
    %c256 = arith.constant 256 : index
    %171 = vector.load %arg3[%c0_45, %c256] : memref<8x768xf32, #tpu.memory_space<vmem>>, vector<8x8xf32>
    tpu.vector_store %arg3[%c0_45, %c256], %166 {strides = array<i32>} : memref<8x768xf32, #tpu.memory_space<vmem>>, vector<8x8xf32>,
    %c0_46 = arith.constant 0 : index
    %c384 = arith.constant 384 : index
    %172 = vector.load %arg3[%c0_46, %c384] : memref<8x768xf32, #tpu.memory_space<vmem>>, vector<8x10xf32>
    tpu.vector_store %arg3[%c0_46, %c384], %124 {strides = array<i32>} : memref<8x768xf32, #tpu.memory_space<vmem>>, vector<8x10xf32>,
    %c0_47 = arith.constant 0 : index
    %c512 = arith.constant 512 : index
    %173 = vector.load %arg3[%c0_47, %c512] : memref<8x768xf32, #tpu.memory_space<vmem>>, vector<8x10xf32>
    tpu.vector_store %arg3[%c0_47, %c512], %93 {strides = array<i32>} : memref<8x768xf32, #tpu.memory_space<vmem>>, vector<8x10xf32>,
    %c0_48 = arith.constant 0 : index
    %c640 = arith.constant 640 : index
    %174 = vector.load %arg3[%c0_48, %c640] : memref<8x768xf32, #tpu.memory_space<vmem>>, vector<8x10xf32>
    tpu.vector_store %arg3[%c0_48, %c640], %102 {strides = array<i32>} : memref<8x768xf32, #tpu.memory_space<vmem>>, vector<8x10xf32>,
    return
  }
}

</mosaic_0001>

<bundles_post_ra>
// kernel: forward.1
= control target key start
LH: loop header
LB: loop body
LE: loop exit
PB: predicated region body
PF: predicated region fallthrough
CT: control target
= control target key end

     0   :  { %v922_v0 = vmov 0.0|0.0   ;;  %vm923_vm0 = vmmov 0   ;;  %v924_v4 = vmov 0.0   ;;  %s925_s20 = smov 112   ;;  %vm25_vm1 = vcmask 261120   ;;  %s926_s23 = smov 104   ;;  %s1141_s1 = inlined_call_operand.vmem [shape: f32[32,256], index: 1, kind: input, shape index: {}]   ;;  %s1142_s0 = inlined_call_operand.vmem [shape: f32[8,51], index: 0, kind: input, shape index: {}]   ;;  %s1143_s2 = inlined_call_operand.vmem [shape: f32[10,128], index: 2, kind: input, shape index: {}]   ;;  %s1144_s3 = inlined_call_operand.vmem [shape: f32[8,768], index: 3, kind: output, shape index: {}]  }
   0x1   :  { %826 = vmatprep.subr.bf16.mxu0 %v922_v0  ;;  %v15_v1 = vld [vmem:[%s1141_s1] sm:$0xff]  ;;  %v17_v2 = vld [vmem:[%s1141_s1 + $0x10] sm:$0xff]  ;;  %782 = vmatprep.mubr.msk.f32.mxu0 %vm923_vm0, %v924_v4  ;;  %vm99_vm2 = vcmask 130048   ;;  %v122_v34 = vlaneseq  ;;  %s927_s25 = smov 40   ;;  %vm214_vm3 = vcmask 64512   ;;  %728 = vst [vmem:[%s1144_s3 + $0x20] sm:$0xff] %v924_v4  ;;  %724 = vst [vmem:[%s1144_s3] sm:$0xff] %v924_v4 }
   0x2   :  { %v965_v3 = vld [vmem:[%s1141_s1 + $0x20] sm:$0xff]  ;;  %v827_v5 = vpack.c.bf16 %v17_v2, %v15_v1  ;;  %v972_v6 = vld [vmem:[%s1141_s1 + $0x30] sm:$0xff]  ;;  %v974_v7 = vpack.i.bf16 %v17_v2, %v15_v1  ;;  %832 = vmatprep.subr.bf16.mxu1 %v922_v0  ;;  %789 = vmatprep.mubr.msk.f32.mxu1 %vm923_vm0, %v924_v4  ;;  %725 = vst [vmem:[%s1144_s3 + $0x8] sm:$0xff] %v924_v4  ;;  %726 = vst [vmem:[%s1144_s3 + $0x10] sm:$0xff] %v924_v4  ;;  %s929_s11 = smov 96   ;;  %vm446_vm4 = vcmask 80896  }
   0x3   :  { %v830_v8 = vpack.c.bf16 %v972_v6, %v965_v3  ;;  %v986_v9 = vld [vmem:[%s1142_s0] sm:$0xff]  ;;  %v996_v36 = vshrl.u32 %v122_v34, 7  ;;  %v874_v48 = vpack.i.bf16 %v972_v6, %v965_v3  ;;  %727 = vst [vmem:[%s1144_s3 + $0x18] sm:$0xff] %v924_v4  ;;  %729 = vst [vmem:[%s1144_s3 + $0x28] sm:$0xff] %v924_v4  ;;  %vm490_vm5 = vcmask 1041408   ;;  %s932_s26 = smov 34  }
   0x4   :  { %828 = vmatpush3.bf16.msra.mxu0 %v827_v5  ;;  %865 = vrot.lane.b32.xlu0 %v974_v7, %s925_s20  ;;  %v1002_v38 = vld [vmem:[%s1143_s2] sm:$0xff]  ;;  %vm931_vm6 = vmmov 1   ;;  %vm569_vm8 = vcmask 523520   ;;  %s933_s27 = smov 120   ;;  %s934_s28 = smov 86  }
   0x5   :  { %829 = vmatprep.subr.bf16.mxu0 %v922_v0  ;;  %v124_v37 = vsub.s32 0, %v996_v36  ;;  %v129_v39 = vsub.s32 1, %v996_v36  ;;  %870 = vrot.lane.b32.xlu1 %v974_v7, %s927_s25  ;;  %vm843_vm7 = vmpackc.low %vm490_vm5, %vm931_vm6 }
   0x7   :  { %v125_v40 = vrot.slane %v1002_v38, %v124_v37  ;;  %v130_v43 = vrot.slane %v1002_v38, %v129_v39 }
   0x8   :  { %831 = vmatpush3.bf16.msra.mxu0 %v830_v8  ;;  %247 = vrot.lane.b32.xlu0 %v15_v1, %s926_s23  ;;  %v238_v8 = vsub.s32 2, %v996_v36 }
   0x9   :  { %835 = vmatprep.subr.bf16.mxu0 %v922_v0  ;;  %875 = vrot.lane.b32.xlu1 %v874_v48, %s927_s25 }
   0xb   :  { %783 = vmatmul.mubr.msk.f32.vlgmr.msra.gmra.mrb[0].mxu0 %vm25_vm1, %v986_v9 }
   0xc   :  { %805 = vmatprep.mubr.msk.f32.mxu0 %vm923_vm0, %v924_v4 }
  0x76   :  { %v866_v10 = vpop.permute.xlu0 %865 }
  0x77   :  { %v868_v11 = vunpack.i.h.bf16 %v866_v10  ;;  %v867_v12 = vunpack.i.l.bf16 %v866_v10  ;;  %v243_v10 = vsub.s32 3, %v996_v36 }
  0x79   :  { %v833_v13 = vpack.c.bf16 %v868_v11, %v867_v12  ;;  %v239_v11 = vrot.slane %v1002_v38, %v238_v8 }
  0x7a   :  { %v248_v47 = vpop.permute.xlu0 %247 }
  0x7b   :  { %834 = vmatpush3.bf16.msra.mxu1 %v833_v13 }
  0x7c   :  { %792 = vmatprep.subr.mxu1 %v924_v4 }
  0xde   :  { %v95_v14 = vpop.f32.mrb[0].mxu0 }
  0xdf   :  { %v100_v15 = vsel %vm99_vm2, %v95_v14, 0.0  ;;  %v784_v16 = vpop.f32.mrb[1].mxu0 }
  0xe0   :  { %v101_v17 = vrot.slane %v100_v15, 4 }
  0xe2   :  { %v102_v18 = vadd.f32 %v101_v17, %v100_v15 }
  0xe4   :  { %v103_v19 = vrot.slane %v102_v18, 2 }
  0xe6   :  { %v104_v20 = vadd.f32 %v103_v19, %v102_v18  ;;  %v458_v18 = vadd.f32 1e-20, %v986_v9  ;;  %v871_v19 = vpop.permute.xlu1 %870 }
  0xe8   :  { %v105_v21 = vrot.slane %v104_v20, 1 }
  0xea   :  { %v106_v22 = vadd.f32 %v105_v21, %v104_v20  ;;  %v873_v20 = vunpack.i.h.bf16 %v871_v19  ;;  %v872_v21 = vunpack.i.l.bf16 %v871_v19  ;;  %v602_v19 = vsub.s32 7, %v996_v36 }
  0xec   :  { %v108_v23 = vmul.f32 0.125, %v106_v22  ;;  %v836_v22 = vpack.c.bf16 %v873_v20, %v872_v21  ;;  %v603_v20 = vrot.slane %v1002_v38, %v602_v19  ;;  %v20_v21 = vld [vmem:[%s1141_s1 + $0x28] sm:$0xff] }
  0xee   :  { %v109_v24 = vsub.f32 %v95_v14, %v108_v23  ;;  %v244_v14 = vrot.slane %v1002_v38, %v243_v10  ;;  %v876_v23 = vpop.permute.xlu1 %875  ;;  %837 = vmatpush3.bf16.msra.mxu0 %v836_v22  ;;  %v22_v22 = vld [vmem:[%s1141_s1 + $0x38] sm:$0xff] }
  0xef   :  { %838 = vmatprep.subr.bf16.mxu0 %v922_v0 }
  0xf0   :  { %v110_v25 = vmul.f32 %v109_v24, %v109_v24 }
  0xf2   :  { %v111_v26 = vsel %vm99_vm2, %v110_v25, 0.0  ;;  %v877_v25 = vunpack.i.l.bf16 %v876_v23 }
  0xf3   :  { %v112_v27 = vrot.slane %v111_v26, 4 }
  0xf5   :  { %v113_v28 = vadd.f32 %v112_v27, %v111_v26 }
  0xf7   :  { %v114_v29 = vrot.slane %v113_v28, 2 }
  0xf9   :  { %v115_v30 = vadd.f32 %v114_v29, %v113_v28  ;;  %v928_v29 = vmov 50  }
  0xfa   :  { %879 = vset.pattern.permute.xlu0 %v928_v29  ;;  %v16_v29 = vld [vmem:[%s1141_s1 + $0x8] sm:$0xff] }
  0xfb   :  { %v116_v31 = vrot.slane %v115_v30, 1  ;;  %472 = vperm.xlu0 %879, %v986_v9  }
  0xfd   :  { %v117_v32 = vadd.f32 %v116_v31, %v115_v30 }
  0xff   :  { %v118_v33 = vmul.f32 0.125, %v117_v32 }
 0x101   :  { %v119_v35 = vadd.f32 1e-05, %v118_v33 }
 0x103   :  { %890 = vrsqrt.f32 %v119_v35 }
 0x10d   :  { %v891_v41 = vpop.eup %890 }
 0x10e   :  { %v121_v42 = vmul.f32 %v891_v41, %v109_v24  ;;  %v878_v24 = vunpack.i.h.bf16 %v876_v23  ;;  %v885_v23 = vpack.i.bf16 %v22_v22, %v20_v21 }
 0x110   :  { %v126_v44 = vmul.f32 %v125_v40, %v121_v42  ;;  %v839_v26 = vpack.c.bf16 %v878_v24, %v877_v25 }
 0x112   :  { %v131_v45 = vadd.f32 %v130_v43, %v126_v44  ;;  %840 = vmatpush3.bf16.msra.mxu0 %v839_v26 }
 0x114   :  { %892 = vtanh.f32 %v131_v45 }
 0x11e   :  { %v893_v46 = vpop.eup %892 }
 0x11f   :  { %790 = vmatmul.mubr.msk.f32.vlgmr.msra.gmra.mrb[0].mxu1 %vm99_vm2, %v893_v46 }
 0x120   :  { %794 = vmatprep.mubr.msk.f32.mxu1 %vm923_vm0, %v924_v4  ;;  %793 = vmatpush3.msra.mxu1 %v248_v47 }
 0x121   :  { %841 = vmatprep.subr.bf16.mxu1 %v922_v0 }
 0x1f2   :  { %v210_v49 = vpop.f32.mrb[0].mxu1 }
 0x1f3   :  { %v215_v50 = vsel %vm214_vm3, %v210_v49, 0.0  ;;  %v791_v51 = vpop.f32.mrb[1].mxu1 }
 0x1f4   :  { %v216_v52 = vrot.slane %v215_v50, 4 }
 0x1f6   :  { %v217_v53 = vadd.f32 %v216_v52, %v215_v50 }
 0x1f8   :  { %v218_v54 = vrot.slane %v217_v53, 2 }
 0x1fa   :  { %v219_v55 = vadd.f32 %v218_v54, %v217_v53 }
 0x1fc   :  { %v220_v56 = vrot.slane %v219_v55, 1 }
 0x1fe   :  { %v221_v57 = vadd.f32 %v220_v56, %v219_v55 }
 0x200   :  { %v222_v58 = vmul.f32 0.125, %v221_v57 }
 0x202   :  { %v223_v59 = vsub.f32 %v210_v49, %v222_v58 }
 0x204   :  { %v224_v60 = vmul.f32 %v223_v59, %v223_v59 }
 0x206   :  { %v225_v61 = vsel %vm214_vm3, %v224_v60, 0.0  ;;  %v346_v60 = vsub.s32 4, %v996_v36 }
 0x207   :  { %v226_v62 = vrot.slane %v225_v61, 4 }
 0x209   :  { %v227_v63 = vadd.f32 %v226_v62, %v225_v61  ;;  %v351_v61 = vsub.s32 5, %v996_v36  ;;  %v347_v62 = vrot.slane %v1002_v38, %v346_v60 }
 0x20b   :  { %v228_v1 = vrot.slane %v227_v63, 2 }
 0x20d   :  { %v229_v2 = vadd.f32 %v228_v1, %v227_v63 }
 0x20f   :  { %v230_v3 = vrot.slane %v229_v2, 1 }
 0x211   :  { %v231_v5 = vadd.f32 %v230_v3, %v229_v2  ;;  %v352_v2 = vrot.slane %v1002_v38, %v351_v61 }
 0x213   :  { %v232_v6 = vmul.f32 0.125, %v231_v5 }
 0x215   :  { %v233_v7 = vadd.f32 1e-05, %v232_v6 }
 0x217   :  { %894 = vrsqrt.f32 %v233_v7  ;;  %v1069_v7 = vld [vmem:[%s1143_s2 + $0x8] sm:$0x3]  ;;  %s930_s2 = smov 32  }
 0x218   :  { %v358_v8 = vrot.slane %v1069_v7, %v124_v37  ;;  %v593_v37 = vsub.s32 6, %v996_v36 }
 0x221   :  { %v895_v12 = vpop.eup %894 }
 0x222   :  { %v235_v13 = vmul.f32 %v895_v12, %v223_v59 }
 0x224   :  { %v240_v15 = vmul.f32 %v239_v11, %v235_v13 }
 0x226   :  { %v245_v16 = vadd.f32 %v244_v14, %v240_v15  ;;  %v473_v14 = vpop.permute.xlu0 %472 }
 0x228   :  { %896 = vtanh.f32 %v245_v16 }
 0x229   :  { %898 = vlog2.f32 %v458_v18  ;;  %v594_v18 = vrot.slane %v1002_v38, %v593_v37 }
 0x232   :  { %v897_v17 = vpop.eup %896 }
 0x233   :  { %795 = vmatmul.mubr.msk.f32.vlgmr.msra.gmra.mrb[2].mxu1 %vm214_vm3, %v897_v17  ;;  %v899_v27 = vpop.eup %898 }
 0x234   :  { %812 = vmatprep.mubr.msk.f32.mxu1 %vm923_vm0, %v924_v4  ;;  %v460_v28 = vmul.f32 0.6931472, %v899_v27 }
 0x236   :  { %v461_v30 = vsub.f32 0.0, %v460_v28 }
 0x238   :  { %v462_v31 = vadd.f32 1e-20, %v461_v30  ;;  %v18_v30 = vld [vmem:[%s1141_s1 + $0x18] sm:$0xff] }
 0x23a   :  { %900 = vlog2.f32 %v462_v31  ;;  %v842_v31 = vpack.c.bf16 %v18_v30, %v16_v29 }
 0x23c   :  { %844 = vmatpush3.bf16.msk.msra.mxu1 %vm843_vm7, %v842_v31 }
 0x23d   :  { %845 = vmatprep.subr.bf16.mxu1 %v922_v0 }
 0x244   :  { %v901_v32 = vpop.eup %900 }
 0x245   :  { %v464_v33 = vmul.f32 0.6931472, %v901_v32 }
 0x247   :  { %v465_v34 = vsub.f32 0.0, %v464_v33 }
 0x249   :  { %467 = vrot.lane.b32.xlu1 %v465_v34, %s929_s11 }
 0x2bb   :  { %v468_v11 = vpop.permute.xlu1 %467 }
 0x306   :  { %v1055_v35 = vpop.f32.mrb[2].mxu1 }
 0x307   :  { %v323_v40 = vsel %vm25_vm1, %v1055_v35, 0.0  ;;  %v796_v41 = vpop.f32.mrb[3].mxu1 }
 0x308   :  { %v324_v42 = vrot.slane %v323_v40, 4 }
 0x30a   :  { %v325_v43 = vadd.f32 %v324_v42, %v323_v40  ;;  %v880_v42 = vpack.i.bf16 %v18_v30, %v16_v29 }
 0x30c   :  { %v326_v44 = vrot.slane %v325_v43, 2 }
 0x30e   :  { %v327_v45 = vadd.f32 %v326_v44, %v325_v43 }
 0x310   :  { %v328_v46 = vrot.slane %v327_v45, 1 }
 0x312   :  { %v329_v47 = vadd.f32 %v328_v46, %v327_v45 }
 0x314   :  { %v330_v48 = vmul.f32 0.125, %v329_v47 }
 0x316   :  { %v331_v49 = vsub.f32 %v1055_v35, %v330_v48 }
 0x318   :  { %v332_v50 = vmul.f32 %v331_v49, %v331_v49 }
 0x31a   :  { %v333_v51 = vsel %vm25_vm1, %v332_v50, 0.0 }
 0x31b   :  { %v334_v52 = vrot.slane %v333_v51, 4 }
 0x31d   :  { %v335_v53 = vadd.f32 %v334_v52, %v333_v51 }
 0x31f   :  { %v336_v54 = vrot.slane %v335_v53, 2 }
 0x321   :  { %v337_v55 = vadd.f32 %v336_v54, %v335_v53 }
 0x323   :  { %v338_v56 = vrot.slane %v337_v55, 1 }
 0x325   :  { %v339_v57 = vadd.f32 %v338_v56, %v337_v55 }
 0x327   :  { %v340_v58 = vmul.f32 0.125, %v339_v57 }
 0x329   :  { %v341_v59 = vadd.f32 1e-05, %v340_v58 }
 0x32b   :  { %902 = vrsqrt.f32 %v341_v59 }
 0x335   :  { %v903_v63 = vpop.eup %902 }
 0x336   :  { %v343_v1 = vmul.f32 %v903_v63, %v331_v49 }
 0x338   :  { %v348_v3 = vmul.f32 %v347_v62, %v343_v1 }
 0x33a   :  { %v353_v5 = vadd.f32 %v352_v2, %v348_v3 }
 0x33c   :  { %904 = vtanh.f32 %v353_v5 }
 0x346   :  { %v905_v6 = vpop.eup %904 }
 0x347   :  { %806 = vmatmul.mubr.msk.f32.vlgmr.msra.gmra.mrb[2].mxu0 %vm25_vm1, %v905_v6 }
 0x41a   :  { %v442_v10 = vpop.f32.mrb[2].mxu0 }
 0x41b   :  { %v1074_v12 = vadd.f32 %v442_v10, %v358_v8  ;;  %v807_v13 = vpop.f32.mrb[3].mxu0 }
 0x41d   :  { %738 = vst.msk [vmem:[%s1144_s3 + $0x20] sm:$0xff] %vm446_vm4, %v1074_v12  ;;  %v470_v15 = vadd.f32 %v468_v11, %v1074_v12  ;;  %v447_v24 = vsel %vm446_vm4, %v1074_v12, -inf }
 0x41f   :  { %v475_v16 = vmul.f32 %v473_v14, %v470_v15 }
 0x421   :  { %v476_v17 = vsel %vm446_vm4, %v475_v16, -inf }
 0x422   :  { %477 = vmax.xlane.f32.xlu1 %v476_v17 }
 0x433   :  { %596 = vrot.lane.b32.xlu1 %v594_v18, %s930_s2  ;;  %v613_v18 = vrot.slane %v1069_v7, %v129_v39 }
 0x437   :  { %605 = vrot.lane.b32.xlu1 %v603_v20, %s930_s2 }
 0x43b   :  { %886 = vrot.lane.b32.xlu1 %v885_v23, %s929_s11 }
 0x45f   :  { %448 = vmax.xlane.f32.xlu1 %v447_v24 }
 0x4af   :  { %v478_v25 = vpop.xlane.xlu1 %477 }
 0x4b0   :  { %v479_v26 = vsub.f32 %v475_v16, %v478_v25 }
 0x4b2   :  { %v480_v38 = vmul.f32 1.442695, %v479_v26 }
 0x4b3   :  { %v597_v59 = vpop.permute.xlu1 %596 }
 0x4b4   :  { %906 = vpow2.f32 %v480_v38 }
 0x4be   :  { %v907_v27 = vpop.eup %906 }
 0x4bf   :  { %v482_v28 = vsel %vm446_vm4, %v907_v27, 0.0 }
 0x4c0   :  { %483 = vadd.xlane.f32.xlu0 %v482_v28 }
 0x54d   :  { %v484_v32 = vpop.xlane.xlu0 %483 }
 0x54e   :  { %908 = vrcp.f32 %v484_v32 }
 0x558   :  { %v909_v33 = vpop.eup %908 }
 0x559   :  { %v486_v34 = vmul.f32 %v909_v33, %v907_v27 }
 0x55b   :  { %737 = vst.msk [vmem:[%s1144_s3 + $0x18] sm:$0xff] %vm446_vm4, %v486_v34  ;;  %813 = vmatmul.mubr.msk.f32.vlgmr.msra.gmra.mrb[4].mxu1 %vm446_vm4, %v486_v34 }
 0x55c   :  { %823 = vmatprep.mubr.msk.f32.mxu1 %vm923_vm0, %v924_v4 }
 0x62e   :  { %v560_v40 = vpop.f32.mrb[4].mxu1 }
 0x62f   :  { %565 = vrot.lane.b32.xlu0 %v560_v40, %s930_s2  ;;  %v814_v41 = vpop.f32.mrb[5].mxu1 }
 0x633   :  { %881 = vrot.lane.b32.xlu0 %v880_v42, %s929_s11 }
 0x6a1   :  { %v566_v43 = vpop.permute.xlu0 %565 }
 0x6a2   :  { %v568_v44 = vadd.f32 %v566_v43, %v1055_v35  ;;  %v606_v35 = vpop.permute.xlu1 %605 }
 0x6a4   :  { %v570_v45 = vsel %vm569_vm8, %v568_v44, 0.0 }
 0x6a5   :  { %v571_v46 = vrot.slane %v570_v45, 4  ;;  %v882_v2 = vpop.permute.xlu0 %881 }
 0x6a6   :  { %v887_v1 = vpop.permute.xlu1 %886  ;;  %v884_v6 = vunpack.i.h.bf16 %v882_v2  ;;  %v883_v8 = vunpack.i.l.bf16 %v882_v2 }
 0x6a7   :  { %v572_v47 = vadd.f32 %v571_v46, %v570_v45  ;;  %v889_v3 = vunpack.i.h.bf16 %v887_v1  ;;  %v888_v5 = vunpack.i.l.bf16 %v887_v1 }
 0x6a8   :  { %v846_v10 = vpack.c.bf16 %v884_v6, %v883_v8 }
 0x6a9   :  { %v573_v48 = vrot.slane %v572_v47, 2  ;;  %v849_v11 = vpack.c.bf16 %v889_v3, %v888_v5 }
 0x6aa   :  { %847 = vmatpush3.bf16.msra.mxu1 %v846_v10  ;;  %v449_v7 = vpop.xlane.xlu1 %448 }
 0x6ab   :  { %v574_v49 = vadd.f32 %v573_v48, %v572_v47  ;;  %848 = vmatprep.subr.bf16.mxu1 %v922_v0  ;;  %v450_v38 = vsub.f32 %v1074_v12, %v449_v7 }
 0x6ad   :  { %v575_v50 = vrot.slane %v574_v49, 1  ;;  %v451_v27 = vmul.f32 1.442695, %v450_v38 }
 0x6ae   :  { %850 = vmatpush3.bf16.msra.mxu1 %v849_v11 }
 0x6af   :  { %v576_v51 = vadd.f32 %v575_v50, %v574_v49 }
 0x6b1   :  { %v577_v52 = vmul.f32 0.125, %v576_v51 }
 0x6b3   :  { %v578_v4 = vsub.f32 %v568_v44, %v577_v52 }
 0x6b5   :  { %v579_v53 = vmul.f32 %v578_v4, %v578_v4 }
 0x6b7   :  { %v580_v54 = vsel %vm569_vm8, %v579_v53, 0.0 }
 0x6b8   :  { %v581_v55 = vrot.slane %v580_v54, 4 }
 0x6ba   :  { %v582_v56 = vadd.f32 %v581_v55, %v580_v54 }
 0x6bc   :  { %v583_v57 = vrot.slane %v582_v56, 2 }
 0x6be   :  { %v584_v58 = vadd.f32 %v583_v57, %v582_v56 }
 0x6c0   :  { %v585_v60 = vrot.slane %v584_v58, 1 }
 0x6c2   :  { %v586_v61 = vadd.f32 %v585_v60, %v584_v58 }
 0x6c4   :  { %v587_v62 = vmul.f32 0.125, %v586_v61 }
 0x6c6   :  { %v588_v63 = vadd.f32 1e-05, %v587_v62 }
 0x6c8   :  { %910 = vrsqrt.f32 %v588_v63 }
 0x6d2   :  { %v911_v13 = vpop.eup %910 }
 0x6d3   :  { %v590_v14 = vmul.f32 %v911_v13, %v578_v4 }
 0x6d5   :  { %v599_v15 = vmul.f32 %v597_v59, %v590_v14 }
 0x6d7   :  { %v608_v16 = vadd.f32 %v606_v35, %v599_v15 }
 0x6d9   :  { %912 = vtanh.f32 %v608_v16 }
 0x6e3   :  { %v913_v17 = vpop.eup %912 }
 0x6e4   :  { %615 = vrot.lane.b32.xlu0 %v913_v17, %s929_s11 }
 0x756   :  { %v616_v37 = vpop.permute.xlu0 %615 }
 0x757   :  { %824 = vmatmul.mubr.msk.f32.vlgmr.msra.gmra.mrb[6].mxu1 %vm25_vm1, %v616_v37 }
 0x82a   :  { %v700_v19 = vpop.f32.mrb[6].mxu1 }
 0x82b   :  { %v701_v20 = vadd.f32 %v700_v19, %v613_v18  ;;  %v825_v21 = vpop.f32.mrb[7].mxu1 }
 0x82d   :  { %v704_v0 = vmul.f32 1.442695, %v701_v20  ;;  %730 = vst.msk [vmem:[%s1144_s3] sm:$0xff] %vm214_vm3, %v701_v20 }
 0x82f   :  { %914 = vpow2.f32 %v704_v0 }
 0x839   :  { %v915_v22 = vpop.eup %914 }
 0x83a   :  { %v706_v23 = vadd.f32 1e-10, %v915_v22 }
 0x83c   :  { %916 = vrsqrt.f32 %v706_v23  ;;  %vm709_vm9 = vcmp.eq.f32.partialorder %v706_v23, inf  ;;  %v712_v26 = vand.u32 2147483648, %v706_v23  ;;  %vm711_vm10 = vcmp.eq.f32.partialorder %v706_v23, 0.0 }
 0x83d   :  { %918 = vpow2.f32 %v451_v27 }
 0x846   :  { %v917_v24 = vpop.eup %916 }
 0x847   :  { %v708_v25 = vmul.f32 %v917_v24, %v706_v23  ;;  %v919_v28 = vpop.eup %918 }
 0x848   :  { %v453_v29 = vsel %vm446_vm4, %v919_v28, 0.0 }
 0x849   :  { %v710_v36 = vsel %vm709_vm9, %v706_v23, %v708_v25 }
 0x84a   :  { %v713_v39 = vsel %vm711_vm10, %v712_v26, %v710_v36 }
 0x84b   :  { %715 = vrot.lane.b32.xlu0 %v713_v39, %s932_s26 }
 0x86a   :  { %454 = vadd.xlane.f32.xlu0 %v453_v29 }
 0x880   :  { %732 = vrot.lane.b32.xlu0 %v915_v22, %s933_s27 }
 0x8bd   :  { %v716_v30 = vpop.permute.xlu0 %715 }
 0x8be   :  { %v718_v31 = vmul.f32 %v716_v30, %v986_v9 }
 0x8c0   :  { %720 = vrot.lane.b32.xlu1 %v718_v31, %s934_s28 }
 0x8f7   :  { %v455_v32 = vpop.xlane.xlu0 %454 }
 0x8f8   :  { %920 = vrcp.f32 %v455_v32 }
 0x8fb   :  { %v733_v33 = vpop.permute.xlu0 %732 }
 0x8fc   :  { %735 = vst.msk [vmem:[%s1144_s3 + $0x8] sm:$0xff] %vm214_vm3, %v733_v33 }
 0x902   :  { %v921_v12 = vpop.eup %920 }
 0x903   :  { %v457_v34 = vmul.f32 %v921_v12, %v919_v28 }
 0x905   :  { %739 = vst.msk [vmem:[%s1144_s3 + $0x28] sm:$0xff] %vm446_vm4, %v457_v34 }
 0x932   :  { %v721_v40 = vpop.permute.xlu1 %720 }
 0x933   :  { %v723_v41 = vadd.f32 %v721_v40, %v701_v20 }
 0x935   :  { %736 = vst.msk [vmem:[%s1144_s3 + $0x10] sm:$0xff] %vm214_vm3, %v723_v41 }

</bundles_post_ra>
